<compile_context>
chip_gen: v7x
topology: tpu7x:2x2x1
jax: 0.10.0
libtpu: 0.0.40
codegen_flags: <defaults>
</compile_context>

<pallas_src>
import jax
import jax.numpy as jnp
from jax.experimental import pallas as pl
from jax.experimental.pallas import tpu as pltpu

_LANES = 128
_MAX_TILE_ROWS = 2048  # 2048*128*4 B = 1 MiB / tile (f32)


def _round_up(n, m):
    return ((n + m - 1) // m) * m


def affine_kernel(ab_ref, x_ref, o_ref):
    # ab_ref: (2,) f32 in SMEM -> [a_eff, c_eff]. Body is a single VPU FMA.
    o_ref[...] = x_ref[...] * ab_ref[0] + ab_ref[1]


@jax.jit
def dnn_forward(x, params):
    """x: (B, 1) float32. params: dict of w1,b1,w2,b2,w3,b3 (weights stored
    (in, out), biases (1, out)). Computes fc3(fc2(fc1(x))) exactly (the stack
    is a linear composition; f32 reassociation only, covered by 1e-5 tol)."""
    B = x.shape[0]
    w1, w2, w3 = params["w1"], params["w2"], params["w3"]
    b1, b2, b3 = params["b1"], params["b2"], params["b3"]

    # Collapse the activation-free Linear stack into one scalar affine map.
    a_eff = (w1 @ w2 @ w3).reshape(())                    # scalar slope
    c_eff = (b1 @ w2 @ w3 + b2 @ w3 + b3).reshape(())     # scalar offset
    ab = jnp.stack([a_eff, c_eff]).astype(jnp.float32)    # (2,) SMEM scalars

    # Lane-dense repack: (B, 1) -> (rows_total, 128).
    rows_needed = max(_round_up(pl.cdiv(B, _LANES), 8), 8)
    if rows_needed <= 8:
        # Tiny batch: single minimal (8, 128) tile, no multi-core benefit.
        n_tiles = 1
        tile_rows = rows_needed
    else:
        # >=2 tiles so the "parallel" axis shards across v7x's 2 TensorCores;
        # more tiles only when a tile would exceed the 2048-row (1 MiB) cap.
        n_tiles = max(2, pl.cdiv(rows_needed, _MAX_TILE_ROWS))
        tile_rows = _round_up(pl.cdiv(rows_needed, n_tiles), 8)
    rows_total = tile_rows * n_tiles
    padded = rows_total * _LANES

    # Under jit these pad/reshape ops fuse with the surrounding computation.
    xf = jnp.pad(x.reshape(B).astype(jnp.float32), (0, padded - B))
    x2d = xf.reshape(rows_total, _LANES)

    out2d = pl.pallas_call(
        affine_kernel,
        out_shape=jax.ShapeDtypeStruct((rows_total, _LANES), jnp.float32),
        grid=(n_tiles,),
        in_specs=[
            pl.BlockSpec(memory_space=pltpu.MemorySpace.SMEM),    # [a_eff, c_eff]
            pl.BlockSpec((tile_rows, _LANES), lambda i: (i, 0)),  # x tile
        ],
        out_specs=pl.BlockSpec((tile_rows, _LANES), lambda i: (i, 0)),
        compiler_params=pltpu.CompilerParams(
            dimension_semantics=("parallel",)),
    )(ab, x2d)

    # Drop padded tail (padded rows hold c_eff) and restore (B, 1) layout.
    return out2d.reshape(padded, 1)[:B]


def init_params(key):
    """Deterministic init mimicking PyTorch's default Linear init
    (uniform in +/- 1/sqrt(fan_in)). Weights stored as (in, out)."""
    def linear(key, fan_in, fan_out):
        kw, kb = jax.random.split(key)
        bound = 1.0 / jnp.sqrt(jnp.float32(fan_in))
        w = jax.random.uniform(kw, (fan_in, fan_out), jnp.float32, -bound, bound)
        b = jax.random.uniform(kb, (1, fan_out), jnp.float32, -bound, bound)
        return w, b

    k1, k2, k3 = jax.random.split(key, 3)
    w1, b1 = linear(k1, 1, 10)
    w2, b2 = linear(k2, 10, 10)
    w3, b3 = linear(k3, 10, 1)
    return {"w1": w1, "b1": b1, "w2": w2, "b2": b2, "w3": w3, "b3": b3}


if __name__ == "__main__":
    key = jax.random.PRNGKey(0)
    kp, kx = jax.random.split(key)
    params = init_params(kp)

    B = 8
    x = jax.random.normal(kx, (B, 1), jnp.float32)

    out = dnn_forward(x, params)
    jax.block_until_ready(out)

    # Cross-check against the layer-by-layer reference of the same forward.
    ref = ((x @ params["w1"] + params["b1"]) @ params["w2"] + params["b2"]) \
          @ params["w3"] + params["b3"]
    assert out.shape == (B, 1)
    assert jnp.allclose(out, ref, atol=1e-5, rtol=1e-5)

    print("KERNEL_OK")
</pallas_src>

<mosaic_0001>
module attributes {stable_mosaic.version = 11 : i64} {
  func.func @affine_kernel(%arg0: i32, %arg1: memref<2xf32, #tpu.memory_space<smem>>, %arg2: memref<8x128xf32, #tpu.memory_space<vmem>>, %arg3: memref<8x128xf32, #tpu.memory_space<vmem>>) attributes {dimension_semantics = [#tpu.dimension_semantics<parallel>], iteration_bounds = array<i64: 1>, scalar_prefetch = 0 : i64, scratch_operands = 0 : i64, tpu.core_type = #tpu.core_type<tc>, window_params = [{transform_indices = @transform_0, window_bounds = array<i64: 2>}, {transform_indices = @transform_1, window_bounds = array<i64: 8, 128>}, {transform_indices = @transform_2, window_bounds = array<i64: 8, 128>}]} {
    %c0 = arith.constant 0 : index
    %c0_0 = arith.constant 0 : index
    %0 = vector.load %arg2[%c0, %c0_0] : memref<8x128xf32, #tpu.memory_space<vmem>>, vector<8x128xf32>
    %c0_1 = arith.constant 0 : index
    %1 = memref.load %arg1[%c0_1] : memref<2xf32, #tpu.memory_space<smem>>
    %2 = vector.broadcast %1 : f32 to vector<8x128xf32>
    %3 = arith.mulf %0, %2 : vector<8x128xf32>
    %c1 = arith.constant 1 : index
    %4 = memref.load %arg1[%c1] : memref<2xf32, #tpu.memory_space<smem>>
    %5 = vector.broadcast %4 : f32 to vector<8x128xf32>
    %6 = arith.addf %3, %5 : vector<8x128xf32>
    %c0_2 = arith.constant 0 : index
    %c0_3 = arith.constant 0 : index
    %7 = vector.load %arg3[%c0_2, %c0_3] : memref<8x128xf32, #tpu.memory_space<vmem>>, vector<8x128xf32>
    tpu.vector_store %arg3[%c0_2, %c0_3], %6 {strides = array<i32>} : memref<8x128xf32, #tpu.memory_space<vmem>>, vector<8x128xf32>,
    return
  }
  func.func @transform_0(%arg0: i32) -> i32 {
    %c0_i32 = arith.constant 0 : i32
    %c0_i32_0 = arith.constant 0 : i32
    return %c0_i32 : i32
  }
  func.func @transform_1(%arg0: i32) -> (i32, i32) {
    %c0_i32 = arith.constant 0 : i32
    %c0_i32_0 = arith.constant 0 : i32
    return %arg0, %c0_i32 : i32, i32
  }
  func.func @transform_2(%arg0: i32) -> (i32, i32) {
    %c0_i32 = arith.constant 0 : i32
    %c0_i32_0 = arith.constant 0 : i32
    return %arg0, %c0_i32 : i32, i32
  }
}

</mosaic_0001>

<bundles_post_ra>
// kernel: dnn_forward.1
= control target key start
LH: loop header
LB: loop body
LE: loop exit
PB: predicated region body
PF: predicated region fallthrough
CT: control target
= control target key end

     0   :  { %7 = vsyncpa [#allocation3], 0  ;;  %s78_s0 = inlined_call_operand.vmem [shape: f32[2], index: 0, kind: input, shape index: {}]   ;;  %s79_s1 = inlined_call_operand.vmem [shape: f32[8,128], index: 1, kind: input, shape index: {}]   ;;  %s80_s2 = inlined_call_operand.vmem [shape: f32[8,128], index: 2, kind: output, shape index: {}]  }
   0x1   :  { %s14_s11 = sshll.u32 %s78_s0, 4  ;;  %s15_s11 = int_to_ptr.vmem [resolvable:$true] %s14_s11 }
   0x2   :  { %s39_s12 = scalar_lea.vmem %s15_s11, 16  ;;  %p44_p1 = scmp.lt.s32.totalorder %s15_s11, %s15_s11 }
   0x3   :  { %p40_p0 = scmp.ne.s32.totalorder %s15_s11, %s39_s12  ;;  %p45_p2 = scmp.lt.s32.totalorder %s39_s12, %s39_s12 }
   0x5   :  { %p46_p3 = por %p45_p2, %p44_p1 }
   0x7   :  { %p47_p4 = pnand %p46_p3, %p40_p0 }
   0x9   :  { %50 = shalt.err (!%p47_p4)
}
   0xa   :  { %s53_s13 = smov [#allocation2]  }
   0xb   :  { %17 = dma.vmem_to_smem %s15_s11, 16, %s53_s13, [#allocation3]  }
   0xc   :  { %51 = dma.done.wait [#allocation3], 16  }
   0xd   :  { %52 = vsyncadd [#allocation3], 4294967280 }
   0xe   :  { %23 = sfence }
   0xf   :  { %s25_s14 = sld [smem:[#allocation2]]  ;;  %s37_s15 = sld [smem:[#allocation2 + $0x1]]  ;;  %v24_v0 = vld [vmem:[%s79_s1] sm:$0xff] }
  0x15   :  { %v26_v1 = vstv %s25_s14  ;;  %v29_v2 = vstv %s37_s15 }
  0x16   :  { %v27_v3 = vmul.f32 %v26_v1, %v24_v0 }
  0x18   :  { %v30_v4 = vadd.f32 %v29_v2, %v27_v3 }
  0x1a   :  { %31 = vst [vmem:[%s80_s2] sm:$0xff] %v30_v4 }
  0x1b   :  { %36 = vsyncpa [#allocation3], 1 }

</bundles_post_ra>
